<compile_context>
chip_gen: v5e
topology: v5e:2x2
jax: 0.10.0
libtpu: 0.0.40
codegen_flags: <defaults>
</compile_context>

<pallas_src>
import functools

import jax
import jax.numpy as jnp
from jax.experimental import pallas as pl
from jax.experimental.pallas import tpu as pltpu


def _round_up(v, m):
    return (v + m - 1) // m * m


def _propagate_kernel(a_ref, xs_ref, nout_ref, o_ref, acc_ref):
    """One (dst-tile i, src-tile k) grid step.

    a_ref   : (tile_n, tile_k) bf16  adjacency tile, A[dst, src] (exact 0/1)
    xs_ref  : (tile_k, F)      f32   pre-scaled source features (x * norm_in)
    nout_ref: (tile_n, 1)      f32   destination normalization
    o_ref   : (tile_n, F)            output tile (resident across the k axis)
    acc_ref : (tile_n, F)      f32   VMEM accumulator scratch
    """
    k = pl.program_id(1)

    @pl.when(k == 0)
    def _init():
        acc_ref[...] = jnp.zeros_like(acc_ref)

    # A is exact 0/1 in bf16; widen on the VPU (hidden under the HBM-bound
    # adjacency stream) and accumulate in f32 on the MXU.
    acc_ref[...] += jnp.dot(
        a_ref[...].astype(jnp.float32),
        xs_ref[...],
        preferred_element_type=jnp.float32,
    )

    @pl.when(k == pl.num_programs(1) - 1)
    def _finalize():
        o_ref[...] = (acc_ref[...] * nout_ref[...]).astype(o_ref.dtype)


def gcn_norm(adj, add_self_loop=True):
    """norm_in / norm_out from a dense adjacency (A[dst, src] = 1 per edge).

    For a static graph, compute this once and pass it via `norms=` so the
    per-call path does not re-read the full N^2 adjacency (mirrors the
    module's cached_norm).
    """
    in_degs = jnp.sum(adj, axis=1, dtype=jnp.float32)    # per-dst in-degree
    out_degs = jnp.sum(adj, axis=0, dtype=jnp.float32)   # per-src out-degree
    if add_self_loop:
        in_degs = in_degs + 1.0
        out_degs = out_degs + 1.0
    norm_in = jax.lax.rsqrt(jnp.clip(in_degs, 1.0))
    norm_out = jax.lax.rsqrt(jnp.clip(out_degs, 1.0))
    return norm_in, norm_out


@functools.partial(
    jax.jit, static_argnames=("add_self_loop", "tile_n", "tile_k"))
def propagate(x, adj, norms=None, add_self_loop=True, *,
              tile_n=256, tile_k=512):
    """x: (N, F) float32 node features; adj: (N, N) float32 with
    adj[dst, src] = 1.0 for each edge src -> dst.

    tile_n: destination-node tile (MXU M dim). 256 for v6e/v7x, 128 for v5e.
    tile_k: source-node tile (reduction dim). Multiples of 128/256.
    """
    N, F = x.shape
    assert adj.shape == (N, N)

    if norms is None:
        norm_in, norm_out = gcn_norm(adj, add_self_loop)
    else:
        norm_in, norm_out = norms

    # Clamp tiles to the (8-aligned) problem size.
    tile_n = min(tile_n, _round_up(N, 8))
    tile_k = min(tile_k, _round_up(N, 8))
    n_dst = _round_up(N, tile_n)   # padded destination-node count
    n_src = _round_up(N, tile_k)   # padded source-node count

    # Hoisted prescale: one fused XLA pass over (N, F) instead of redoing the
    # multiply on every grid step inside the kernel.
    xs = (x.astype(jnp.float32) * norm_in[:, None]).astype(jnp.float32)
    xs = jnp.pad(xs, ((0, n_src - N), (0, 0)))

    # Adjacency in bf16: lossless for 0/1 values, halves the dominant stream.
    a = jnp.pad(adj.astype(jnp.bfloat16), ((0, n_dst - N), (0, n_src - N)))

    nout = jnp.pad(norm_out.astype(jnp.float32)[:, None],
                   ((0, n_dst - N), (0, 0)))

    grid = (n_dst // tile_n, n_src // tile_k)

    # Explicit VMEM budget: double-buffered streams + accumulator, 2x headroom,
    # never below the default scoped limit (safe on v5e/v6e/v7x for sane tiles).
    itemsize_out = jnp.dtype(x.dtype).itemsize
    est_vmem = (
        2 * tile_n * tile_k * 2            # double-buffered bf16 A tiles
        + 2 * tile_k * F * 4               # double-buffered f32 xs tiles
        + 2 * tile_n * 1 * 4               # double-buffered norm_out tiles
        + 2 * tile_n * F * itemsize_out    # output tile buffers
        + tile_n * F * 4                   # accumulator scratch
    )
    vmem_limit = int(max(2 * est_vmem, 32 * 1024 * 1024))

    out = pl.pallas_call(
        _propagate_kernel,
        out_shape=jax.ShapeDtypeStruct((n_dst, F), x.dtype),
        grid_spec=pltpu.PrefetchScalarGridSpec(
            num_scalar_prefetch=0,
            grid=grid,
            in_specs=[
                # adjacency tile for (dst tile i, src tile k)
                pl.BlockSpec((tile_n, tile_k), lambda i, k: (i, k)),
                # pre-scaled source features for src tile k
                pl.BlockSpec((tile_k, F), lambda i, k: (k, 0)),
                # norm_out for dst tile i
                pl.BlockSpec((tile_n, 1), lambda i, k: (i, 0)),
            ],
            # output block index is constant along k -> resident accumulator
            out_specs=pl.BlockSpec((tile_n, F), lambda i, k: (i, 0)),
            scratch_shapes=[pltpu.VMEM((tile_n, F), jnp.float32)],
        ),
        compiler_params=pltpu.CompilerParams(
            dimension_semantics=("parallel", "arbitrary"),
            vmem_limit_bytes=vmem_limit,
        ),
    )(a, xs, nout)

    return out[:N]


def _reference(x, adj, add_self_loop=True):
    norm_in, norm_out = gcn_norm(adj, add_self_loop)
    xs = x * norm_in[:, None]
    h = jnp.matmul(adj, xs, precision=jax.lax.Precision.HIGHEST)
    return h * norm_out[:, None]


if __name__ == "__main__":
    key = jax.random.PRNGKey(0)
    k_feat, k_adj = jax.random.split(key)

    N, F = 320, 32  # 320 nodes, 32-dim node features
    x = jax.random.normal(k_feat, (N, F), dtype=jnp.float32)
    # deterministic sparse-ish random graph (~10% edge density), no self loops
    adj = (jax.random.uniform(k_adj, (N, N)) < 0.1).astype(jnp.float32)
    adj = adj * (1.0 - jnp.eye(N, dtype=jnp.float32))

    # default (large, v6e/v7x-oriented) tiles: exercises dst-dim padding
    out = jax.block_until_ready(propagate(x, adj, add_self_loop=True))

    # small tiles (v5e-style): exercises the full 2-D (dst, src) accumulation
    # grid plus padding on both node dimensions
    out_tiled = jax.block_until_ready(
        propagate(x, adj, add_self_loop=True, tile_n=128, tile_k=128))

    ref = _reference(x, adj, add_self_loop=True)
    assert out.shape == (N, F)
    assert jnp.allclose(out, ref, atol=1e-4, rtol=1e-4)
    assert jnp.allclose(out_tiled, ref, atol=1e-4, rtol=1e-4)
    print("KERNEL_OK")
</pallas_src>

<mosaic_0001>
module attributes {stable_mosaic.version = 11 : i64} {
  func.func @_propagate_kernel(%arg0: i32, %arg1: i32, %arg2: memref<256x320xbf16, #tpu.memory_space<vmem>>, %arg3: memref<320x32xf32, #tpu.memory_space<vmem>>, %arg4: memref<256x1xf32, #tpu.memory_space<vmem>>, %arg5: memref<256x32xf32, #tpu.memory_space<vmem>>, %arg6: memref<256x32xf32, #tpu.memory_space<vmem>>) attributes {dimension_semantics = [#tpu.dimension_semantics<parallel>, #tpu.dimension_semantics<arbitrary>], iteration_bounds = array<i64: 2, 1>, scalar_prefetch = 0 : i64, scratch_operands = 1 : i64, tpu.core_type = #tpu.core_type<tc>, window_params = [{transform_indices = @transform_0, window_bounds = array<i64: 256, 320>}, {transform_indices = @transform_1, window_bounds = array<i64: 320, 32>}, {transform_indices = @transform_2, window_bounds = array<i64: 256, 1>}, {transform_indices = @transform_3, window_bounds = array<i64: 256, 32>}]} {
    %c0_i32 = arith.constant 0 : i32
    %0 = arith.cmpi eq, %arg1, %c0_i32 : i32
    %1 = arith.extui %0 : i1 to i32
    %c0_i32_0 = arith.constant 0 : i32
    %2 = arith.cmpi ne, %1, %c0_i32_0 : i32
    scf.if %2 {
      %cst_10 = arith.constant 0.000000e+00 : f32
      %13 = vector.broadcast %cst_10 : f32 to vector<256x32xf32>
      %c0_11 = arith.constant 0 : index
      %c0_12 = arith.constant 0 : index
      %14 = vector.load %arg6[%c0_11, %c0_12] : memref<256x32xf32, #tpu.memory_space<vmem>>, vector<256x32xf32>
      tpu.vector_store %arg6[%c0_11, %c0_12], %13 {strides = array<i32>} : memref<256x32xf32, #tpu.memory_space<vmem>>, vector<256x32xf32>,
    } else {
    }
    %c0 = arith.constant 0 : index
    %c0_1 = arith.constant 0 : index
    %3 = vector.load %arg6[%c0, %c0_1] : memref<256x32xf32, #tpu.memory_space<vmem>>, vector<256x32xf32>
    %c0_2 = arith.constant 0 : index
    %c0_3 = arith.constant 0 : index
    %4 = vector.load %arg2[%c0_2, %c0_3] : memref<256x320xbf16, #tpu.memory_space<vmem>>, vector<256x320xbf16>
    %5 = arith.extf %4 : vector<256x320xbf16> to vector<256x320xf32>
    %c0_4 = arith.constant 0 : index
    %c0_5 = arith.constant 0 : index
    %6 = vector.load %arg3[%c0_4, %c0_5] : memref<320x32xf32, #tpu.memory_space<vmem>>, vector<320x32xf32>
    %cst = arith.constant dense<0.000000e+00> : vector<256x32xf32>
    %7 = tpu.matmul %5, %6, %cst {dimension_numbers = #tpu.dot_dimension_numbers<[1], [0], [0], [1], [0, 0, 1, 1], [], []>} : vector<256x320xf32>, vector<320x32xf32>, vector<256x32xf32> -> vector<256x32xf32>
    %8 = arith.addf %3, %7 : vector<256x32xf32>
    %c0_6 = arith.constant 0 : index
    %c0_7 = arith.constant 0 : index
    %9 = vector.load %arg6[%c0_6, %c0_7] : memref<256x32xf32, #tpu.memory_space<vmem>>, vector<256x32xf32>
    tpu.vector_store %arg6[%c0_6, %c0_7], %8 {strides = array<i32>} : memref<256x32xf32, #tpu.memory_space<vmem>>, vector<256x32xf32>,
    %c0_i32_8 = arith.constant 0 : i32
    %10 = arith.cmpi eq, %arg1, %c0_i32_8 : i32
    %11 = arith.extui %10 : i1 to i32
    %c0_i32_9 = arith.constant 0 : i32
    %12 = arith.cmpi ne, %11, %c0_i32_9 : i32
    scf.if %12 {
      %c0_10 = arith.constant 0 : index
      %c0_11 = arith.constant 0 : index
      %13 = vector.load %arg6[%c0_10, %c0_11] : memref<256x32xf32, #tpu.memory_space<vmem>>, vector<256x32xf32>
      %c0_12 = arith.constant 0 : index
      %c0_13 = arith.constant 0 : index
      %14 = vector.load %arg4[%c0_12, %c0_13] : memref<256x1xf32, #tpu.memory_space<vmem>>, vector<256x1xf32>
      %15 = vector.broadcast %14 : vector<256x1xf32> to vector<256x32xf32>
      %16 = arith.mulf %13, %15 : vector<256x32xf32>
      %c0_14 = arith.constant 0 : index
      %c0_15 = arith.constant 0 : index
      %17 = vector.load %arg5[%c0_14, %c0_15] : memref<256x32xf32, #tpu.memory_space<vmem>>, vector<256x32xf32>
      tpu.vector_store %arg5[%c0_14, %c0_15], %16 {strides = array<i32>} : memref<256x32xf32, #tpu.memory_space<vmem>>, vector<256x32xf32>,
    } else {
    }
    return
  }
  func.func @transform_0(%arg0: i32, %arg1: i32) -> (i32, i32) {
    %c0_i32 = arith.constant 0 : i32
    return %arg0, %arg1 : i32, i32
  }
  func.func @transform_1(%arg0: i32, %arg1: i32) -> (i32, i32) {
    %c0_i32 = arith.constant 0 : i32
    %c0_i32_0 = arith.constant 0 : i32
    return %arg1, %c0_i32 : i32, i32
  }
  func.func @transform_2(%arg0: i32, %arg1: i32) -> (i32, i32) {
    %c0_i32 = arith.constant 0 : i32
    %c0_i32_0 = arith.constant 0 : i32
    return %arg0, %c0_i32 : i32, i32
  }
  func.func @transform_3(%arg0: i32, %arg1: i32) -> (i32, i32) {
    %c0_i32 = arith.constant 0 : i32
    %c0_i32_0 = arith.constant 0 : i32
    return %arg0, %c0_i32 : i32, i32
  }
}

</mosaic_0001>

<bundles_post_ra>
// kernel: propagate.1
= control target key start
LH: loop header
LB: loop body
LE: loop exit
PB: predicated region body
PF: predicated region fallthrough
CT: control target
= control target key end

     0   :  { %s1570_s12 = smov 0   ;;  %s1572_s13 = smov 0   ;;  %s2231_s0 = inlined_call_operand.vmem [shape: bf16[512,320], index: 0, kind: input, shape index: {}]   ;;  %s2232_s1 = inlined_call_operand.vmem [shape: f32[320,32], index: 1, kind: input, shape index: {}]   ;;  %s2233_s2 = inlined_call_operand.vmem [shape: f32[512,1], index: 2, kind: input, shape index: {}]   ;;  %s2234_s3 = inlined_call_operand.vmem [shape: f32[512,32], index: 3, kind: output, shape index: {}]  }
   0x1   :  { %s1574_s14 = smov 0  }
   0x2 LB: > { %s25_s15 = sadd.s32 1, %s1542_s13  ;;  %p1413_p0 = scmp.ge.s32.totalorder %s1546_s14, 1  ;;  %s1546_s14 = sphi %s1574_s14, %s13_s14   ;;  %s1542_s13 = sphi %s1572_s13, %s2236_s13   ;;  %s1538_s12 = sphi %s1570_s12, %s2235_s12  }
   0x3   : > { %p27_p1 = scmp.ge.s32.totalorder %s25_s15, 2  ;;  %p180_p2 = scmp.lt.s32.totalorder %s1546_s14, 3 }
   0x5   : > { %s2238_s15 = smov (%p27_p1, %s25_s15), 0  ;;  %p181_p3 = pnand %p1413_p0, %p180_p2 }
   0x6   : > { %s1414_s22 = sshll.u32 (!%p181_p3), %s1538_s12, 5 }
   0x7   : > { %184 = sbr.rel (%p181_p3) target bundleno = 378 (0x17a), region = 32  ;;  %p221_p4 = scmp.lt.s32.totalorder (!%p181_p3), %s1414_s22, 63 }
   0xc   : > { %v493_v0 = vld [vmem:[%s2232_s1 + $0x78] sm:$0xff]  ;;  %v492_v3 = vld [vmem:[%s2232_s1 + $0x70] sm:$0xff]  ;;  %v491_v6 = vld [vmem:[%s2232_s1 + $0x68] sm:$0xff]  ;;  %s2240_s22 = smov (!%p221_p4, %s1414_s22), 63  ;;  %vm518_vm0 = vcmask 523264   ;;  %v1548_v33 = vmov 0  }
   0xd   : > { %v1594_v1 = vld [vmem:[%s2232_s1 + $0xf8] sm:$0xff]  ;;  %615 = vmatpush.msra.mxu0 %v493_v0  ;;  %1454 = vmatpush.msra.mxu3 %v493_v0  ;;  %v1607_v4 = vld [vmem:[%s2232_s1 + $0xf0] sm:$0xff]  ;;  %v1622_v7 = vld [vmem:[%s2232_s1 + $0xe8] sm:$0xff]  ;;  %s1494_s17 = smul.u32 12, %s2240_s22  ;;  %s1417_s11 = sshll.u32 %s2240_s22, 3  ;;  %vm253_vm1 = vcmask 261120  }
   0xe   : > { %v1599_v2 = vld [vmem:[%s2232_s1 + $0x138] sm:$0xff]  ;;  %v1612_v5 = vld [vmem:[%s2232_s1 + $0x130] sm:$0xff]  ;;  %728 = vmatpush.msra.mxu1 %v1594_v1  ;;  %v1627_v8 = vld [vmem:[%s2232_s1 + $0x128] sm:$0xff]  ;;  %1521 = vset.pattern.permute.xlu0 %v1548_v33  ;;  %s1768_s24 = scalar_lea.vmem %s2233_s2, %s1417_s11 }
   0xf   : > { %849 = vmatpush.msra.mxu2 %v1599_v2  ;;  %616 = vmatpush.msra.mxu0 %v492_v3  ;;  %v490_v9 = vld [vmem:[%s2232_s1 + $0x60] sm:$0xff]  ;;  %v489_v12 = vld [vmem:[%s2232_s1 + $0x58] sm:$0xff]  ;;  %s1665_s27 = scalar_lea.vmem %s2231_s0, %s1494_s17  ;;  %v488_v15 = vld [vmem:[%s2232_s1 + $0x50] sm:$0xff]  ;;  %s2031_s17 = scalar_lea.vmem %s2234_s3, %s1417_s11 }
  0x10   : > { %1455 = vmatpush.msra.mxu3 %v492_v3  ;;  %729 = vmatpush.msra.mxu1 %v1607_v4  ;;  %v1639_v10 = vld [vmem:[%s2232_s1 + $0xe0] sm:$0xff]  ;;  %v1655_v13 = vld [vmem:[%s2232_s1 + $0xd8] sm:$0xff]  ;;  %v1675_v16 = vld [vmem:[%s2232_s1 + $0xd0] sm:$0xff] }
  0x11   : > { %850 = vmatpush.msra.mxu2 %v1612_v5  ;;  %617 = vmatpush.msra.mxu0 %v491_v6  ;;  %v1644_v11 = vld [vmem:[%s2232_s1 + $0x120] sm:$0xff]  ;;  %v1660_v14 = vld [vmem:[%s2232_s1 + $0x118] sm:$0xff]  ;;  %v1680_v17 = vld [vmem:[%s2232_s1 + $0x110] sm:$0xff] }
  0x12   : > { %1456 = vmatpush.msra.mxu3 %v491_v6  ;;  %730 = vmatpush.msra.mxu1 %v1622_v7  ;;  %v487_v18 = vld [vmem:[%s2232_s1 + $0x48] sm:$0xff]  ;;  %v486_v22 = vld [vmem:[%s2232_s1 + $0x40] sm:$0xff]  ;;  %v485_v26 = vld [vmem:[%s2232_s1 + $0x38] sm:$0xff] }
  0x13   : > { %851 = vmatpush.msra.mxu2 %v1627_v8  ;;  %618 = vmatpush.msra.mxu0 %v490_v9  ;;  %v319_v19 = vld [vmem:[%s1665_s27 + $0x8] sm:$0xf]  ;;  %v1706_v23 = vld [vmem:[%s2232_s1 + $0xc0] sm:$0xff]  ;;  %v1721_v27 = vld [vmem:[%s2232_s1 + $0xb8] sm:$0xff] }
  0x14   : > { %1457 = vmatpush.msra.mxu3 %v490_v9  ;;  %731 = vmatpush.msra.mxu1 %v1639_v10  ;;  %v1691_v20 = vld [vmem:[%s2232_s1 + $0xc8] sm:$0xff]  ;;  %v1711_v24 = vld [vmem:[%s2232_s1 + $0x100] sm:$0xff]  ;;  %v384_v25 = vunpack.c.l.bf16 %v319_v19  ;;  %v484_v28 = vld [vmem:[%s2232_s1 + $0x30] sm:$0xff] }
  0x15   : > { %852 = vmatpush.msra.mxu2 %v1644_v11  ;;  %619 = vmatpush.msra.mxu0 %v489_v12  ;;  %v1696_v21 = vld [vmem:[%s2232_s1 + $0x108] sm:$0xff]  ;;  %v1732_v29 = vld [vmem:[%s2232_s1 + $0xb0] sm:$0xff]  ;;  %v482_v34 = vld [vmem:[%s2232_s1 + $0x20] sm:$0xff] }
  0x16   : > { %1458 = vmatpush.msra.mxu3 %v489_v12  ;;  %732 = vmatpush.msra.mxu1 %v1655_v13  ;;  %v483_v30 = vld [vmem:[%s2232_s1 + $0x28] sm:$0xff]  ;;  %v321_v31 = vld [vmem:[%s1665_s27 + $0x14] sm:$0xf]  ;;  %v1752_v35 = vld [vmem:[%s2232_s1 + $0xa0] sm:$0xff] }
  0x17   : > { %853 = vmatpush.msra.mxu2 %v1660_v14  ;;  %620 = vmatpush.msra.mxu0 %v488_v15  ;;  %v1742_v32 = vld [vmem:[%s2232_s1 + $0xa8] sm:$0xff]  ;;  %v387_v36 = vunpack.c.l.bf16 %v321_v31  ;;  %v481_v37 = vld [vmem:[%s2232_s1 + $0x18] sm:$0xff]  ;;  %v480_v39 = vld [vmem:[%s2232_s1 + $0x10] sm:$0xff] }
  0x18   : > { %1459 = vmatpush.msra.mxu3 %v488_v15  ;;  %733 = vmatpush.msra.mxu1 %v1675_v16  ;;  %v1761_v38 = vld [vmem:[%s2232_s1 + $0x98] sm:$0xff]  ;;  %v1778_v40 = vld [vmem:[%s2232_s1 + $0x90] sm:$0xff]  ;;  %v479_v41 = vld [vmem:[%s2232_s1 + $0x8] sm:$0xff] }
  0x19   : > { %854 = vmatpush.msra.mxu2 %v1680_v17  ;;  %621 = vmatpush.msra.mxu0 %v487_v18  ;;  %v318_v42 = vld [vmem:[%s1665_s27] sm:$0xff]  ;;  %v1792_v45 = vld [vmem:[%s2232_s1 + $0x88] sm:$0xff]  ;;  %v322_v61 = vld [vmem:[%s1665_s27 + $0x18] sm:$0xff] }
  0x1a   : > { %1460 = vmatpush.msra.mxu3 %v487_v18  ;;  %734 = vmatpush.msra.mxu1 %v1691_v20  ;;  %v1786_v43 = vld [vmem:[%s1665_s27 + $0x120] sm:$0xff]  ;;  %v382_v49 = vunpack.c.l.bf16 %v318_v42  ;;  %v383_v51 = vunpack.c.h.bf16 %v318_v42  ;;  %v320_v53 = vld [vmem:[%s1665_s27 + $0xc] sm:$0xff]  ;;  %v1821_v62 = vld [vmem:[%s1665_s27 + $0x138] sm:$0xff] }
  0x1b   : > { %855 = vmatpush.msra.mxu2 %v1696_v21  ;;  %622 = vmatpush.msra.mxu0 %v486_v22  ;;  %v1054_v44 = vld [vmem:[%s1768_s24] sm:$0xff]  ;;  %v454_v50 = vunpack.c.l.bf16 %v1786_v43  ;;  %v1810_v54 = vld [vmem:[%s1665_s27 + $0x12c] sm:$0xff]  ;;  %v385_v57 = vunpack.c.l.bf16 %v320_v53  ;;  %v386_v59 = vunpack.c.h.bf16 %v320_v53  ;;  %v327_v0 = vld [vmem:[%s1665_s27 + $0x38] sm:$0xf]  ;;  %v460_v3 = vunpack.c.l.bf16 %v1821_v62 }
  0x1c   : > { %1461 = vmatpush.msra.mxu3 %v486_v22  ;;  %735 = vmatpush.msra.mxu1 %v1706_v23  ;;  %v323_v46 = vld [vmem:[%s1665_s27 + $0x20] sm:$0xf]  ;;  %v1055_v55 = vld [vmem:[%s1768_s24 + $0x8] sm:$0xff]  ;;  %v457_v58 = vunpack.c.l.bf16 %v1810_v54  ;;  %v1056_v63 = vld [vmem:[%s1768_s24 + $0x10] sm:$0xff]  ;;  %v396_v6 = vunpack.c.l.bf16 %v327_v0 }
  0x1d   : > { %856 = vmatpush.msra.mxu2 %v1711_v24  ;;  %623 = vmatpush.msra.mxu0 %v485_v26  ;;  %v478_v47 = vld [vmem:[%s2232_s1] sm:$0xff]  ;;  %v390_v52 = vunpack.c.l.bf16 %v323_v46  ;;  %v325_v56 = vld [vmem:[%s1665_s27 + $0x2c] sm:$0xf]  ;;  %v326_v19 = vld [vmem:[%s1665_s27 + $0x30] sm:$0xff] }
  0x1e   : > { %1420 = vmatmul.msk.f32.vlgmr.msra.gmra.mxu2 %vm518_vm0, %v384_v25  ;;  %1462 = vmatpush.msra.mxu3 %v485_v26  ;;  %v1802_v48 = vld [vmem:[%s2232_s1 + $0x80] sm:$0xff]  ;;  %v393_v60 = vunpack.c.l.bf16 %v325_v56  ;;  %v331_v22 = vld [vmem:[%s1665_s27 + $0x50] sm:$0xf]  ;;  %v395_v26 = vunpack.c.h.bf16 %v326_v19  ;;  %v1061_v31 = vld [vmem:[%s1768_s24 + $0x38] sm:$0xff] }
  0x1f   : > { %736 = vmatpush.msra.mxu1 %v1721_v27  ;;  %624 = vmatpush.msra.mxu0 %v484_v28  ;;  %v1832_v9 = vld [vmem:[%s1665_s27 + $0x144] sm:$0xff]  ;;  %v1072_v0 = vld [vmem:[%s1768_s24 + $0x90] sm:$0xff] }
  0x20   : > { %1463 = vmatpush.msra.mxu3 %v484_v28  ;;  %1522 = vset.pattern.permute.xlu1 %v1548_v33  ;;  %v329_v12 = vld [vmem:[%s1665_s27 + $0x44] sm:$0xf]  ;;  %v463_v15 = vunpack.c.l.bf16 %v1832_v9  ;;  %v328_v28 = vld [vmem:[%s1665_s27 + $0x3c] sm:$0xff]  ;;  %v335_v42 = vld [vmem:[%s1665_s27 + $0x68] sm:$0xf] }
  0x21   : > { %737 = vmatpush.msra.mxu1 %v1732_v29  ;;  %625 = vmatpush.msra.mxu0 %v483_v30  ;;  %v399_v18 = vunpack.c.l.bf16 %v329_v12  ;;  %v408_v46 = vunpack.c.l.bf16 %v335_v42  ;;  %v1059_v56 = vld [vmem:[%s1768_s24 + $0x28] sm:$0xff]  ;;  %v343_v12 = vld [vmem:[%s1665_s27 + $0x98] sm:$0xf] }
  0x22   : > { %1464 = vmatpush.msra.mxu3 %v483_v30  ;;  %1523 = vset.pattern.permute.xlu2 %v1548_v33  ;;  %v1853_v30 = vld [vmem:[%s1665_s27 + $0x15c] sm:$0xff] }
  0x23   : > { %738 = vmatpush.msra.mxu1 %v1742_v32  ;;  %626 = vmatpush.msra.mxu0 %v482_v34  ;;  %v333_v33 = vld [vmem:[%s1665_s27 + $0x5c] sm:$0xf] }
  0x24   : > { %1465 = vmatpush.msra.mxu3 %v482_v34  ;;  %1088 = vperm.xlu0 %1521, %v1054_v44   ;;  %v469_v34 = vunpack.c.l.bf16 %v1853_v30 }
  0x25   : > { %739 = vmatpush.msra.mxu1 %v1752_v35  ;;  %627 = vmatpush.msra.mxu0 %v481_v37 }
  0x26   : > { %1421 = vmatmul.msk.f32.gmra.mxu2 %vm518_vm0, %v387_v36  ;;  %1466 = vmatpush.msra.mxu3 %v481_v37  ;;  %v405_v36 = vunpack.c.l.bf16 %v333_v33  ;;  %v330_v37 = vld [vmem:[%s1665_s27 + $0x48] sm:$0xff]  ;;  %v1068_v33 = vld [vmem:[%s1768_s24 + $0x70] sm:$0xff] }
  0x27   : > { %740 = vmatpush.msra.mxu1 %v1761_v38  ;;  %628 = vmatpush.msra.mxu0 %v480_v39 }
  0x28   : > { %1467 = vmatpush.msra.mxu3 %v480_v39  ;;  %1098 = vperm.xlu1 %1522, %v1056_v63   ;;  %v1064_v39 = vld [vmem:[%s1768_s24 + $0x50] sm:$0xff]  ;;  %v1073_v63 = vld [vmem:[%s1768_s24 + $0x98] sm:$0xff] }
  0x29   : > { %741 = vmatpush.msra.mxu1 %v1778_v40  ;;  %629 = vmatpush.msra.mxu0 %v479_v41 }
  0x2a   : > { %1468 = vmatpush.msra.mxu3 %v479_v41  ;;  %v1063_v41 = vld [vmem:[%s1768_s24 + $0x48] sm:$0xff] }
  0x2b   : > { %742 = vmatpush.msra.mxu1 %v1792_v45  ;;  %630 = vmatpush.msra.mxu0 %v478_v47 }
  0x2c   : > { %1469 = vmatpush.msra.mxu3 %v478_v47  ;;  %631 = vmatmul.f32.vlgmr.msra.gmra.mxu0 %v382_v49  ;;  %v332_v47 = vld [vmem:[%s1665_s27 + $0x54] sm:$0xff]  ;;  %v1058_v49 = vld [vmem:[%s1768_s24 + $0x20] sm:$0xff] }
  0x2d   : > { %743 = vmatpush.msra.mxu1 %v1802_v48  ;;  %703 = vmatmul.f32.vlgmr.msra.gmra.mxu3 %v454_v50  ;;  %v1066_v50 = vld [vmem:[%s1768_s24 + $0x60] sm:$0xff] }
  0x2e   : > { %744 = vmatmul.f32.vlgmr.msra.gmra.mxu1 %v383_v51  ;;  %1422 = vmatmul.msk.f32.gmra.mxu2 %vm518_vm0, %v390_v52  ;;  %v337_v51 = vld [vmem:[%s1665_s27 + $0x74] sm:$0xf]  ;;  %v404_v52 = vunpack.c.h.bf16 %v332_v47 }
  0x2f   : > { %1470 = vmatpush.msrb.mxu3 %v1594_v1  ;;  %1093 = vperm.xlu0 %1521, %v1055_v55   ;;  %v388_v1 = vunpack.c.l.bf16 %v322_v61  ;;  %v411_v53 = vunpack.c.l.bf16 %v337_v51  ;;  %v334_v55 = vld [vmem:[%s1665_s27 + $0x60] sm:$0xff] }
  0x30   : > { %1108 = vperm.xlu2 %1523, %v1058_v49   ;;  %v1084_v49 = vld [vmem:[%s1768_s24 + $0xf0] sm:$0xff] }
  0x31   : > { %1471 = vmatpush.msrb.mxu3 %v1607_v4  ;;  %v389_v4 = vunpack.c.h.bf16 %v322_v61  ;;  %v336_v61 = vld [vmem:[%s1665_s27 + $0x6c] sm:$0xff] }
  0x33   : > { %1472 = vmatpush.msrb.mxu3 %v1622_v7  ;;  %v324_v7 = vld [vmem:[%s1665_s27 + $0x24] sm:$0xff] }
  0x34   : > { %634 = vmatmul.f32.gmra.mxu0 %v385_v57  ;;  %v1070_v57 = vld [vmem:[%s1768_s24 + $0x80] sm:$0xff] }
  0x35   : > { %706 = vmatmul.f32.gmra.mxu3 %v457_v58  ;;  %v1069_v58 = vld [vmem:[%s1768_s24 + $0x78] sm:$0xff] }
  0x36   : > { %747 = vmatmul.f32.gmra.mxu1 %v386_v59  ;;  %1423 = vmatmul.msk.f32.gmra.mxu2 %vm518_vm0, %v393_v60  ;;  %v407_v59 = vunpack.c.h.bf16 %v334_v55 }
  0x37   : > { %1473 = vmatpush.msrb.mxu3 %v1639_v10  ;;  %v1057_v10 = vld [vmem:[%s1768_s24 + $0x18] sm:$0xff] }
  0x38   : > { %1103 = vperm.xlu1 %1522, %v1057_v10   ;;  %1113 = vperm.xlu2 %1523, %v1059_v56   ;;  %v1075_v10 = vld [vmem:[%s1768_s24 + $0xa8] sm:$0xff] }
  0x39   : > { %1474 = vmatpush.msrb.mxu3 %v1655_v13  ;;  %v391_v13 = vunpack.c.l.bf16 %v324_v7 }
  0x3b   : > { %1475 = vmatpush.msrb.mxu3 %v1675_v16  ;;  %v392_v16 = vunpack.c.h.bf16 %v324_v7  ;;  %v1076_v7 = vld [vmem:[%s1768_s24 + $0xb0] sm:$0xff] }
  0x3c   : > { %637 = vmatmul.f32.gmra.mxu0 %v388_v1  ;;  %v458_v1 = vunpack.c.h.bf16 %v1810_v54 }
  0x3d   : > { %709 = vmatmul.f32.gmra.mxu3 %v460_v3 }
  0x3e   : > { %750 = vmatmul.f32.gmra.mxu1 %v389_v4  ;;  %1424 = vmatmul.msk.f32.gmra.mxu2 %vm518_vm0, %v396_v6  ;;  %v338_v4 = vld [vmem:[%s1665_s27 + $0x78] sm:$0xff]  ;;  %v1062_v6 = vld [vmem:[%s1768_s24 + $0x40] sm:$0xff] }
  0x3f   : > { %1476 = vmatpush.msrb.mxu3 %v1691_v20  ;;  %v1843_v20 = vld [vmem:[%s1665_s27 + $0x150] sm:$0xff]  ;;  %v412_v54 = vunpack.c.l.bf16 %v338_v4 }
  0x40   : > { %v466_v25 = vunpack.c.l.bf16 %v1843_v20  ;;  %1123 = vperm.xlu1 %1522, %v1061_v31   ;;  %1128 = vperm.xlu2 %1523, %v1062_v6   ;;  %v342_v31 = vld [vmem:[%s1665_s27 + $0x90] sm:$0xff] }
  0x41   : > { %1477 = vmatpush.msrb.mxu3 %v1706_v23  ;;  %v394_v23 = vunpack.c.l.bf16 %v326_v19  ;;  %v345_v19 = vld [vmem:[%s1665_s27 + $0xa4] sm:$0xf] }
  0x43   : > { %1478 = vmatpush.msrb.mxu3 %v1721_v27  ;;  %v402_v27 = vunpack.c.l.bf16 %v331_v22  ;;  %v1065_v22 = vld [vmem:[%s1768_s24 + $0x58] sm:$0xff] }
  0x44   : > { %640 = vmatmul.f32.gmra.mxu0 %v391_v13  ;;  %v461_v13 = vunpack.c.h.bf16 %v1821_v62  ;;  %v464_v62 = vunpack.c.h.bf16 %v1832_v9  ;;  %v418_v9 = vunpack.c.l.bf16 %v342_v31 }
  0x45   : > { %712 = vmatmul.f32.gmra.mxu3 %v463_v15  ;;  %v413_v15 = vunpack.c.h.bf16 %v338_v4 }
  0x46   : > { %753 = vmatmul.f32.gmra.mxu1 %v392_v16  ;;  %1425 = vmatmul.msk.f32.gmra.mxu2 %vm518_vm0, %v399_v18  ;;  %v420_v16 = vunpack.c.l.bf16 %v343_v12  ;;  %v340_v18 = vld [vmem:[%s1665_s27 + $0x84] sm:$0xff]  ;;  %v357_v12 = vld [vmem:[%s1665_s27 + $0xec] sm:$0xf] }
  0x47   : > { %1479 = vmatpush.msrb.mxu3 %v1732_v29  ;;  %v1060_v29 = vld [vmem:[%s1768_s24 + $0x30] sm:$0xff] }
  0x48   : > { %1118 = vperm.xlu0 %1521, %v1060_v29   ;;  %1138 = vperm.xlu1 %1522, %v1064_v39   ;;  %v347_v29 = vld [vmem:[%s1665_s27 + $0xb0] sm:$0xf] }
  0x49   : > { %1480 = vmatpush.msrb.mxu3 %v1742_v32  ;;  %v397_v32 = vunpack.c.l.bf16 %v328_v28  ;;  %1143 = vperm.xlu2 %1523, %v1065_v22   ;;  %v426_v39 = vunpack.c.l.bf16 %v347_v29  ;;  %v354_v29 = vld [vmem:[%s1665_s27 + $0xd8] sm:$0xff] }
  0x4b   : > { %1481 = vmatpush.msrb.mxu3 %v1752_v35  ;;  %v398_v35 = vunpack.c.h.bf16 %v328_v28  ;;  %v423_v28 = vunpack.c.l.bf16 %v345_v19 }
  0x4c   : > { %643 = vmatmul.f32.gmra.mxu0 %v394_v23  ;;  %v1079_v23 = vld [vmem:[%s1768_s24 + $0xc8] sm:$0xff] }
  0x4d   : > { %715 = vmatmul.f32.gmra.mxu3 %v466_v25  ;;  %v1078_v25 = vld [vmem:[%s1768_s24 + $0xc0] sm:$0xff] }
  0x4e   : > { %756 = vmatmul.f32.gmra.mxu1 %v395_v26  ;;  %1426 = vmatmul.msk.f32.gmra.mxu2 %vm518_vm0, %v402_v27  ;;  %v415_v26 = vunpack.c.l.bf16 %v340_v18  ;;  %v416_v27 = vunpack.c.h.bf16 %v340_v18 }
  0x4f   : > { %1482 = vmatpush.msrb.mxu3 %v1761_v38  ;;  %v1865_v38 = vld [vmem:[%s1665_s27 + $0x168] sm:$0xff] }
  0x50   : > { %1133 = vperm.xlu0 %1521, %v1063_v41   ;;  %v472_v44 = vunpack.c.l.bf16 %v1865_v38  ;;  %v349_v41 = vld [vmem:[%s1665_s27 + $0xbc] sm:$0xf]  ;;  %v473_v51 = vunpack.c.h.bf16 %v1865_v38  ;;  %v348_v38 = vld [vmem:[%s1665_s27 + $0xb4] sm:$0xff] }
  0x51   : > { %1483 = vmatpush.msrb.mxu3 %v1778_v40  ;;  %v400_v40 = vunpack.c.l.bf16 %v330_v37  ;;  %1158 = vperm.xlu2 %1523, %v1068_v33   ;;  %v427_v56 = vunpack.c.l.bf16 %v348_v38  ;;  %v375_v33 = vld [vmem:[%s1665_s27 + $0x158] sm:$0xf] }
  0x53   : > { %1484 = vmatpush.msrb.mxu3 %v1792_v45  ;;  %v401_v45 = vunpack.c.h.bf16 %v330_v37  ;;  %v419_v37 = vunpack.c.h.bf16 %v342_v31 }
  0x54   : > { %646 = vmatmul.f32.gmra.mxu0 %v397_v32  ;;  %v1082_v32 = vld [vmem:[%s1768_s24 + $0xe0] sm:$0xff] }
  0x55   : > { %718 = vmatmul.f32.gmra.mxu3 %v469_v34  ;;  %v1081_v34 = vld [vmem:[%s1768_s24 + $0xd8] sm:$0xff] }
  0x56   : > { %759 = vmatmul.f32.gmra.mxu1 %v398_v35  ;;  %1427 = vmatmul.msk.f32.gmra.mxu2 %vm518_vm0, %v405_v36  ;;  %v1549_v35 = vmov 0.0   ;;  %v467_v36 = vunpack.c.h.bf16 %v1843_v20  ;;  %v344_v20 = vld [vmem:[%s1665_s27 + $0x9c] sm:$0xff] }
  0x57   : > { %1485 = vmatpush.msrb.mxu3 %v1802_v48  ;;  %v1877_v48 = vld [vmem:[%s1665_s27 + $0x174] sm:$0xff]  ;;  %254 = vst.msk [vmem:[#allocation2] sm:$0xff] %vm253_vm1, %v1549_v35  ;;  %v421_v42 = vunpack.c.l.bf16 %v344_v20 }
  0x58   : > { %1148 = vperm.xlu0 %1521, %v1066_v50   ;;  %255 = vst.msk [vmem:[#allocation2 + $0x8] sm:$0xff] %vm253_vm1, %v1549_v35 }
  0x59   : > { %1486 = vmatpush.msra.mxu3 %v1599_v2  ;;  %v1067_v2 = vld [vmem:[%s1768_s24 + $0x68] sm:$0xff]  ;;  %256 = vst.msk [vmem:[#allocation2 + $0x10] sm:$0xff] %vm253_vm1, %v1549_v35 }
  0x5a   : > { %1153 = vperm.xlu1 %1522, %v1067_v2   ;;  %257 = vst.msk [vmem:[#allocation2 + $0x18] sm:$0xff] %vm253_vm1, %v1549_v35  ;;  %v351_v2 = vld [vmem:[%s1665_s27 + $0xc8] sm:$0xf] }
  0x5b   : > { %1487 = vmatpush.msra.mxu3 %v1612_v5  ;;  %v403_v5 = vunpack.c.l.bf16 %v332_v47  ;;  %258 = vst.msk [vmem:[#allocation2 + $0x20] sm:$0xff] %vm253_vm1, %v1549_v35  ;;  %v1085_v47 = vld [vmem:[%s1768_s24 + $0xf8] sm:$0xff] }
  0x5c   : > { %649 = vmatmul.f32.gmra.mxu0 %v400_v40  ;;  %259 = vst.msk [vmem:[#allocation2 + $0x28] sm:$0xff] %vm253_vm1, %v1549_v35  ;;  %v470_v40 = vunpack.c.h.bf16 %v1853_v30  ;;  %v346_v30 = vld [vmem:[%s1665_s27 + $0xa8] sm:$0xff] }
  0x5d   : > { %1488 = vmatpush.msra.mxu3 %v1627_v8  ;;  %v475_v8 = vunpack.c.l.bf16 %v1877_v48  ;;  %260 = vst.msk [vmem:[#allocation2 + $0x30] sm:$0xff] %vm253_vm1, %v1549_v35  ;;  %v424_v50 = vunpack.c.l.bf16 %v346_v30 }
  0x5e   : > { %721 = vmatmul.f32.gmra.mxu3 %v472_v44  ;;  %762 = vmatmul.f32.gmra.mxu1 %v401_v45  ;;  %261 = vst.msk [vmem:[#allocation2 + $0x38] sm:$0xff] %vm253_vm1, %v1549_v35  ;;  %v422_v44 = vunpack.c.h.bf16 %v344_v20  ;;  %v429_v45 = vunpack.c.l.bf16 %v349_v41  ;;  %v286_v4 = vld [vmem:[#allocation2] sm:$0xff] }
  0x5f   : > { %1428 = vmatmul.msk.f32.gmra.mxu2 %vm518_vm0, %v408_v46  ;;  %1489 = vmatpush.msra.mxu3 %v1644_v11  ;;  %v339_v11 = vld [vmem:[%s1665_s27 + $0x80] sm:$0xf]  ;;  %262 = vst.msk [vmem:[#allocation2 + $0x40] sm:$0xff] %vm253_vm1, %v1549_v35  ;;  %v1071_v46 = vld [vmem:[%s1768_s24 + $0x88] sm:$0xff] }
  0x60   : > { %1163 = vperm.xlu0 %1521, %v1069_v58   ;;  %v414_v60 = vunpack.c.l.bf16 %v339_v11  ;;  %263 = vst.msk [vmem:[#allocation2 + $0x48] sm:$0xff] %vm253_vm1, %v1549_v35  ;;  %1173 = vperm.xlu2 %1523, %v1071_v46   ;;  %v428_v58 = vunpack.c.h.bf16 %v348_v38  ;;  %v288_v46 = vld [vmem:[#allocation2 + $0x10] sm:$0xff] }
  0x61   : > { %1490 = vmatpush.msra.mxu3 %v1660_v14  ;;  %v455_v14 = vunpack.c.h.bf16 %v1786_v43  ;;  %v409_v43 = vunpack.c.l.bf16 %v336_v61  ;;  %264 = vst.msk [vmem:[#allocation2 + $0x50] sm:$0xff] %vm253_vm1, %v1549_v35 }
  0x62   : > { %1168 = vperm.xlu1 %1522, %v1070_v57   ;;  %265 = vst.msk [vmem:[#allocation2 + $0x58] sm:$0xff] %vm253_vm1, %v1549_v35  ;;  %v476_v57 = vunpack.c.h.bf16 %v1877_v48  ;;  %v350_v48 = vld [vmem:[%s1665_s27 + $0xc0] sm:$0xff] }
  0x63   : > { %1491 = vmatpush.msra.mxu3 %v1680_v17  ;;  %v406_v17 = vunpack.c.l.bf16 %v334_v55  ;;  %266 = vst.msk [vmem:[#allocation2 + $0x60] sm:$0xff] %vm253_vm1, %v1549_v35 }
  0x64   : > { %652 = vmatmul.f32.gmra.mxu0 %v403_v5  ;;  %267 = vst.msk [vmem:[#allocation2 + $0x68] sm:$0xff] %vm253_vm1, %v1549_v35  ;;  %v425_v5 = vunpack.c.h.bf16 %v346_v30  ;;  %v377_v30 = vld [vmem:[%s1665_s27 + $0x164] sm:$0xf] }
  0x65   : > { %1492 = vmatpush.msra.mxu3 %v1696_v21  ;;  %v341_v21 = vld [vmem:[%s1665_s27 + $0x8c] sm:$0xf]  ;;  %268 = vst.msk [vmem:[#allocation2 + $0x70] sm:$0xff] %vm253_vm1, %v1549_v35 }
  0x66   : > { %724 = vmatmul.f32.gmra.mxu3 %v475_v8  ;;  %765 = vmatmul.f32.gmra.mxu1 %v404_v52  ;;  %v417_v3 = vunpack.c.l.bf16 %v341_v21  ;;  %269 = vst.msk [vmem:[#allocation2 + $0x78] sm:$0xff] %vm253_vm1, %v1549_v35  ;;  %v432_v8 = vunpack.c.l.bf16 %v351_v2  ;;  %v1074_v52 = vld [vmem:[%s1768_s24 + $0xa0] sm:$0xff]  ;;  %v431_v21 = vunpack.c.h.bf16 %v350_v48 }
  0x67   : > { %1429 = vmatmul.msk.f32.gmra.mxu2 %vm518_vm0, %v411_v53  ;;  %1493 = vmatpush.msra.mxu3 %v1711_v24  ;;  %v410_v24 = vunpack.c.h.bf16 %v336_v61  ;;  %270 = vst.msk [vmem:[#allocation2 + $0x80] sm:$0xff] %vm253_vm1, %v1549_v35  ;;  %v353_v53 = vld [vmem:[%s1665_s27 + $0xd4] sm:$0xf]  ;;  %v430_v61 = vunpack.c.l.bf16 %v350_v48  ;;  %v289_v48 = vld [vmem:[#allocation2 + $0x18] sm:$0xff] }
  0x68   : > { %1178 = vperm.xlu0 %1521, %v1072_v0   ;;  %271 = vst.msk [vmem:[#allocation2 + $0x88] sm:$0xff] %vm253_vm1, %v1549_v35  ;;  %1188 = vperm.xlu2 %1523, %v1074_v52   ;;  %v435_v11 = vunpack.c.l.bf16 %v353_v53  ;;  %v471_v53 = vunpack.c.l.bf16 %v377_v30 }
  0x69   : > { %272 = vst.msk [vmem:[#allocation2 + $0x90] sm:$0xff] %vm253_vm1, %v1549_v35 }
  0x6a   : > { %1183 = vperm.xlu1 %1522, %v1073_v63   ;;  %273 = vst.msk [vmem:[#allocation2 + $0x98] sm:$0xff] %vm253_vm1, %v1549_v35 }
  0x6b   : > { %274 = vst.msk [vmem:[#allocation2 + $0xa0] sm:$0xff] %vm253_vm1, %v1549_v35 }
  0x6c   : > { %655 = vmatmul.f32.gmra.mxu0 %v406_v17  ;;  %275 = vst.msk [vmem:[#allocation2 + $0xa8] sm:$0xff] %vm253_vm1, %v1549_v35  ;;  %v371_v17 = vld [vmem:[%s1665_s27 + $0x140] sm:$0xf] }
  0x6d   : > { %276 = vst.msk [vmem:[#allocation2 + $0xb0] sm:$0xff] %vm253_vm1, %v1549_v35  ;;  %v462_v63 = vunpack.c.l.bf16 %v371_v17 }
  0x6e   : > { %816 = vmatmul.f32.vlgmr.msrb.gmra.mxu3 %v455_v14  ;;  %768 = vmatmul.f32.gmra.mxu1 %v407_v59  ;;  %277 = vst.msk [vmem:[#allocation2 + $0xb8] sm:$0xff] %vm253_vm1, %v1549_v35  ;;  %v1077_v14 = vld [vmem:[%s1768_s24 + $0xb8] sm:$0xff]  ;;  %v355_v59 = vld [vmem:[%s1665_s27 + $0xe0] sm:$0xf] }
  0x6f   : > { %1430 = vmatmul.msk.f32.gmra.mxu2 %vm518_vm0, %v414_v60  ;;  %278 = vst.msk [vmem:[#allocation2 + $0xc0] sm:$0xff] %vm253_vm1, %v1549_v35 }
  0x70   : > { %1193 = vperm.xlu0 %1521, %v1075_v10   ;;  %279 = vst.msk [vmem:[#allocation2 + $0xc8] sm:$0xff] %vm253_vm1, %v1549_v35  ;;  %1203 = vperm.xlu2 %1523, %v1077_v14   ;;  %v373_v10 = vld [vmem:[%s1665_s27 + $0x14c] sm:$0xf] }
  0x71   : > { %280 = vst.msk [vmem:[#allocation2 + $0xd0] sm:$0xff] %vm253_vm1, %v1549_v35  ;;  %v465_v18 = vunpack.c.l.bf16 %v373_v10 }
  0x72   : > { %1198 = vperm.xlu1 %1522, %v1076_v7   ;;  %281 = vst.msk [vmem:[#allocation2 + $0xd8] sm:$0xff] %vm253_vm1, %v1549_v35  ;;  %v352_v7 = vld [vmem:[%s1665_s27 + $0xcc] sm:$0xff] }
  0x73   : > { %282 = vst.msk [vmem:[#allocation2 + $0xe0] sm:$0xff] %vm253_vm1, %v1549_v35  ;;  %v434_v22 = vunpack.c.h.bf16 %v352_v7 }
  0x74   : > { %658 = vmatmul.f32.gmra.mxu0 %v409_v43  ;;  %283 = vst.msk [vmem:[#allocation2 + $0xe8] sm:$0xff] %vm253_vm1, %v1549_v35  ;;  %v438_v43 = vunpack.c.l.bf16 %v355_v59 }
  0x75   : > { %284 = vst.msk [vmem:[#allocation2 + $0xf0] sm:$0xff] %vm253_vm1, %v1549_v35 }
  0x76   : > { %819 = vmatmul.f32.gmra.mxu3 %v458_v1  ;;  %771 = vmatmul.f32.gmra.mxu1 %v410_v24  ;;  %285 = vst.msk [vmem:[#allocation2 + $0xf8] sm:$0xff] %vm253_vm1, %v1549_v35  ;;  %v1080_v1 = vld [vmem:[%s1768_s24 + $0xd0] sm:$0xff] }
  0x77   : > { %1431 = vmatmul.msk.f32.gmra.mxu2 %vm518_vm0, %v417_v3 }
  0x78   : > { %1208 = vperm.xlu0 %1521, %v1078_v25   ;;  %1218 = vperm.xlu2 %1523, %v1080_v1   ;;  %v1083_v25 = vld [vmem:[%s1768_s24 + $0xe8] sm:$0xff] }
  0x7a   : > { %1213 = vperm.xlu1 %1522, %v1079_v23   ;;  %v441_v23 = vunpack.c.l.bf16 %v357_v12 }
  0x7c   : > { %661 = vmatmul.f32.gmra.mxu0 %v412_v54 }
  0x7e   : > { %822 = vmatmul.f32.gmra.mxu3 %v461_v13  ;;  %774 = vmatmul.f32.gmra.mxu1 %v413_v15 }
  0x7f   : > { %1432 = vmatmul.msk.f32.gmra.mxu2 %vm518_vm0, %v420_v16  ;;  %v433_v16 = vunpack.c.l.bf16 %v352_v7 }
  0x80   : > { %1223 = vperm.xlu0 %1521, %v1081_v34   ;;  %1233 = vperm.xlu2 %1523, %v1083_v25  }
  0x82   : > { %1228 = vperm.xlu1 %1522, %v1082_v32   ;;  %v359_v32 = vld [vmem:[%s1665_s27 + $0xf8] sm:$0xf] }
  0x84   : > { %664 = vmatmul.f32.gmra.mxu0 %v415_v26 }
  0x86   : > { %825 = vmatmul.f32.gmra.mxu3 %v464_v62  ;;  %777 = vmatmul.f32.gmra.mxu1 %v416_v27  ;;  %v287_v27 = vld [vmem:[#allocation2 + $0x8] sm:$0xff] }
  0x87   : > { %1433 = vmatmul.msk.f32.gmra.mxu2 %vm518_vm0, %v423_v28 }
  0x88   : > { %1238 = vperm.xlu0 %1521, %v1084_v49   ;;  %v356_v49 = vld [vmem:[%s1665_s27 + $0xe4] sm:$0xff] }
  0x89   : > { %v439_v38 = vunpack.c.l.bf16 %v356_v49 }
  0x8a   : > { %1243 = vperm.xlu1 %1522, %v1085_v47  }
  0x8c   : > { %667 = vmatmul.f32.gmra.mxu0 %v418_v9 }
  0x8e   : > { %828 = vmatmul.f32.gmra.mxu3 %v467_v36  ;;  %780 = vmatmul.f32.gmra.mxu1 %v419_v37  ;;  %v436_v37 = vunpack.c.l.bf16 %v354_v29 }
  0x8f   : > { %1434 = vmatmul.msk.f32.gmra.mxu2 %vm518_vm0, %v426_v39  ;;  %v468_v39 = vunpack.c.l.bf16 %v375_v33 }
  0x94   : > { %670 = vmatmul.f32.gmra.mxu0 %v421_v42  ;;  %v437_v42 = vunpack.c.h.bf16 %v354_v29 }
  0x96   : > { %831 = vmatmul.f32.gmra.mxu3 %v470_v40  ;;  %783 = vmatmul.f32.gmra.mxu1 %v422_v44  ;;  %v1089_v28 = vpop.permute.xlu0 %1088  ;;  %v444_v40 = vunpack.c.l.bf16 %v359_v32 }
  0x97   : > { %1435 = vmatmul.msk.f32.gmra.mxu2 %vm518_vm0, %v429_v45 }
  0x9a   : > { %v1099_v17 = vpop.permute.xlu1 %1098 }
  0x9c   : > { %673 = vmatmul.f32.gmra.mxu0 %v424_v50  ;;  %v361_v50 = vld [vmem:[%s1665_s27 + $0x104] sm:$0xf] }
  0x9e   : > { %834 = vmatmul.f32.gmra.mxu3 %v473_v51  ;;  %786 = vmatmul.f32.gmra.mxu1 %v425_v5 }
  0x9f   : > { %1436 = vmatmul.msk.f32.gmra.mxu2 %vm518_vm0, %v432_v8 }
  0xa1   : > { %v858_v55 = vpop.f32.mrf.mxu2  ;;  %v1094_v2 = vpop.permute.xlu0 %1093 }
  0xa4   : > { %676 = vmatmul.f32.gmra.mxu0 %v427_v56 }
  0xa6   : > { %837 = vmatmul.f32.gmra.mxu3 %v476_v57  ;;  %789 = vmatmul.f32.gmra.mxu1 %v428_v58  ;;  %v440_v57 = vunpack.c.h.bf16 %v356_v49  ;;  %v447_v58 = vunpack.c.l.bf16 %v361_v50 }
  0xa7   : > { %1437 = vmatmul.msk.f32.gmra.mxu2 %vm518_vm0, %v435_v11 }
  0xa9   : > { %v861_v60 = vpop.f32.mrf.mxu2  ;;  %v632_v0 = vpop.f32.mrf.mxu0 }
  0xab   : > { %v745_v24 = vpop.f32.mrf.mxu1 }
  0xac   : > { %v746_v3 = vadd.f32 %v745_v24, %v632_v0  ;;  %679 = vmatmul.f32.gmra.mxu0 %v430_v61  ;;  %v379_v61 = vld [vmem:[%s1665_s27 + $0x170] sm:$0xf] }
  0xae   : > { %1446 = vmatmul.msk.f32.vlgmr.msra.gmra.mxu3 %vm518_vm0, %v462_v63  ;;  %v859_v6 = vadd.f32 %v858_v55, %v746_v3  ;;  %792 = vmatmul.f32.gmra.mxu1 %v431_v21  ;;  %v363_v63 = vld [vmem:[%s1665_s27 + $0x110] sm:$0xf]  ;;  %v474_v3 = vunpack.c.l.bf16 %v379_v61 }
  0xaf   : > { %1438 = vmatmul.msk.f32.gmra.mxu2 %vm518_vm0, %v438_v43  ;;  %v450_v10 = vunpack.c.l.bf16 %v363_v63 }
  0xb0   : > { %v954_v54 = vadd.f32 %v859_v6, %v286_v4  ;;  %v2015_v13 = vpop.f32.mrf.mxu3 }
  0xb1   : > { %v864_v15 = vpop.f32.mrf.mxu2  ;;  %v635_v19 = vpop.f32.mrf.mxu0 }
  0xb2   : > { %987 = vst.msk [vmem:[#allocation2] sm:$0xff] %vm253_vm1, %v954_v54 }
  0xb3   : > { %v748_v26 = vpop.f32.mrf.mxu1 }
  0xb4   : > { %v749_v62 = vadd.f32 %v748_v26, %v635_v19  ;;  %682 = vmatmul.f32.gmra.mxu0 %v433_v16  ;;  %v381_v19 = vld [vmem:[%s1665_s27 + $0x17c] sm:$0xf] }
  0xb6   : > { %1447 = vmatmul.msk.f32.gmra.mxu3 %vm518_vm0, %v465_v18  ;;  %v862_v31 = vadd.f32 %v861_v60, %v749_v62  ;;  %795 = vmatmul.f32.gmra.mxu1 %v434_v22  ;;  %v358_v60 = vld [vmem:[%s1665_s27 + $0xf0] sm:$0xff]  ;;  %v360_v18 = vld [vmem:[%s1665_s27 + $0xfc] sm:$0xff]  ;;  %v1104_v22 = vpop.permute.xlu1 %1103 }
  0xb7   : > { %1439 = vmatmul.msk.f32.gmra.mxu2 %vm518_vm0, %v441_v23  ;;  %v442_v24 = vunpack.c.l.bf16 %v358_v60  ;;  %v443_v7 = vunpack.c.h.bf16 %v358_v60  ;;  %v365_v23 = vld [vmem:[%s1665_s27 + $0x11c] sm:$0xf]  ;;  %v446_v32 = vunpack.c.h.bf16 %v360_v18 }
  0xb8   : > { %v955_v34 = vadd.f32 %v862_v31, %v287_v27  ;;  %v2024_v35 = vpop.f32.mrf.mxu3  ;;  %v477_v31 = vunpack.c.l.bf16 %v381_v19 }
  0xb9   : > { %v1022_v9 = vld [vmem:[#allocation2] sm:$0xff]  ;;  %v867_v36 = vpop.f32.mrf.mxu2  ;;  %v638_v41 = vpop.f32.mrf.mxu0 }
  0xba   : > { %988 = vst.msk [vmem:[#allocation2 + $0x8] sm:$0xff] %vm253_vm1, %v955_v34  ;;  %v1246_v20 = vmul.f32 %v1089_v28, %v1022_v9  ;;  %v445_v28 = vunpack.c.l.bf16 %v360_v18  ;;  %v453_v34 = vunpack.c.l.bf16 %v365_v23 }
  0xbb   : > { %v751_v44 = vpop.f32.mrf.mxu1 }
  0xbc   : > { %1278 = vst.msk [vmem:[%s2031_s17] sm:$0xff] %vm253_vm1, %v1246_v20  ;;  %v752_v45 = vadd.f32 %v751_v44, %v638_v41  ;;  %685 = vmatmul.f32.gmra.mxu0 %v436_v37  ;;  %v291_v37 = vld [vmem:[#allocation2 + $0x28] sm:$0xff] }
  0xbd   : > { %v362_v41 = vld [vmem:[%s1665_s27 + $0x108] sm:$0xff] }
  0xbe   : > { %1448 = vmatmul.msk.f32.gmra.mxu3 %vm518_vm0, %v468_v39  ;;  %v865_v47 = vadd.f32 %v864_v15, %v752_v45  ;;  %798 = vmatmul.f32.gmra.mxu1 %v437_v42  ;;  %v290_v15 = vld [vmem:[#allocation2 + $0x20] sm:$0xff]  ;;  %v1109_v39 = vpop.permute.xlu2 %1108  ;;  %v367_v42 = vld [vmem:[%s1665_s27 + $0x128] sm:$0xf]  ;;  %v1124_v23 = vpop.permute.xlu1 %1123 }
  0xbf   : > { %1440 = vmatmul.msk.f32.gmra.mxu2 %vm518_vm0, %v444_v40  ;;  %v456_v50 = vunpack.c.l.bf16 %v367_v42 }
  0xc0   : > { %v956_v51 = vadd.f32 %v865_v47, %v288_v46  ;;  %v2041_v5 = vpop.f32.mrf.mxu3  ;;  %v448_v47 = vunpack.c.l.bf16 %v362_v41 }
  0xc1   : > { %v1023_v8 = vld [vmem:[#allocation2 + $0x8] sm:$0xff]  ;;  %v870_v52 = vpop.f32.mrf.mxu2  ;;  %v641_v56 = vpop.f32.mrf.mxu0 }
  0xc2   : > { %989 = vst.msk [vmem:[#allocation2 + $0x10] sm:$0xff] %vm253_vm1, %v956_v51  ;;  %v1247_v55 = vmul.f32 %v1094_v2, %v1023_v8  ;;  %v449_v2 = vunpack.c.h.bf16 %v362_v41 }
  0xc3   : > { %v754_v11 = vpop.f32.mrf.mxu1 }
  0xc4   : > { %1279 = vst.msk [vmem:[%s2031_s17 + $0x8] sm:$0xff] %vm253_vm1, %v1247_v55  ;;  %v755_v14 = vadd.f32 %v754_v11, %v641_v56  ;;  %688 = vmatmul.f32.gmra.mxu0 %v439_v38  ;;  %v369_v56 = vld [vmem:[%s1665_s27 + $0x134] sm:$0xf] }
  0xc5   : > { %v459_v61 = vunpack.c.l.bf16 %v369_v56 }
  0xc6   : > { %1449 = vmatmul.msk.f32.gmra.mxu3 %vm518_vm0, %v471_v53  ;;  %v868_v59 = vadd.f32 %v867_v36, %v755_v14  ;;  %801 = vmatmul.f32.gmra.mxu1 %v440_v57  ;;  %v364_v53 = vld [vmem:[%s1665_s27 + $0x114] sm:$0xff]  ;;  %v1114_v55 = vpop.permute.xlu2 %1113 }
  0xc7   : > { %1441 = vmatmul.msk.f32.gmra.mxu2 %vm518_vm0, %v447_v58  ;;  %v452_v60 = vunpack.c.h.bf16 %v364_v53 }
  0xc8   : > { %v957_v0 = vadd.f32 %v868_v59, %v289_v48  ;;  %v2051_v21 = vpop.f32.mrf.mxu3  ;;  %v451_v48 = vunpack.c.l.bf16 %v364_v53  ;;  %v297_v53 = vld [vmem:[#allocation2 + $0x58] sm:$0xff] }
  0xc9   : > { %v1024_v43 = vld [vmem:[#allocation2 + $0x10] sm:$0xff]  ;;  %v873_v1 = vpop.f32.mrf.mxu2  ;;  %v644_v6 = vpop.f32.mrf.mxu0 }
  0xca   : > { %990 = vst.msk [vmem:[#allocation2 + $0x18] sm:$0xff] %vm253_vm1, %v957_v0  ;;  %v1248_v4 = vmul.f32 %v1099_v17, %v1024_v43  ;;  %v293_v43 = vld [vmem:[#allocation2 + $0x38] sm:$0xff] }
  0xcb   : > { %v757_v12 = vpop.f32.mrf.mxu1 }
  0xcc   : > { %1280 = vst.msk [vmem:[%s2031_s17 + $0x10] sm:$0xff] %vm253_vm1, %v1248_v4  ;;  %v758_v54 = vadd.f32 %v757_v12, %v644_v6  ;;  %691 = vmatmul.f32.gmra.mxu0 %v442_v24  ;;  %v1119_v4 = vpop.permute.xlu0 %1118 }
  0xce   : > { %1450 = vmatmul.msk.f32.gmra.mxu3 %vm518_vm0, %v474_v3  ;;  %v871_v16 = vadd.f32 %v870_v52, %v758_v54  ;;  %804 = vmatmul.f32.gmra.mxu1 %v443_v7  ;;  %v292_v52 = vld [vmem:[#allocation2 + $0x30] sm:$0xff] }
  0xcf   : > { %1442 = vmatmul.msk.f32.gmra.mxu2 %vm518_vm0, %v450_v10 }
  0xd0   : > { %v958_v25 = vadd.f32 %v871_v16, %v290_v15  ;;  %v2061_v26 = vpop.f32.mrf.mxu3  ;;  %v294_v16 = vld [vmem:[#allocation2 + $0x40] sm:$0xff] }
  0xd1   : > { %v1025_v62 = vld [vmem:[#allocation2 + $0x18] sm:$0xff]  ;;  %v876_v27 = vpop.f32.mrf.mxu2  ;;  %v647_v33 = vpop.f32.mrf.mxu0 }
  0xd2   : > { %991 = vst.msk [vmem:[#allocation2 + $0x20] sm:$0xff] %vm253_vm1, %v958_v25  ;;  %v1249_v29 = vmul.f32 %v1104_v22, %v1025_v62 }
  0xd3   : > { %v760_v9 = vpop.f32.mrf.mxu1 }
  0xd4   : > { %1281 = vst.msk [vmem:[%s2031_s17 + $0x18] sm:$0xff] %vm253_vm1, %v1249_v29  ;;  %v761_v36 = vadd.f32 %v760_v9, %v647_v33  ;;  %694 = vmatmul.f32.gmra.mxu0 %v445_v28 }
  0xd6   : > { %1451 = vmatmul.msk.f32.gmra.mxu3 %vm518_vm0, %v477_v31  ;;  %v874_v20 = vadd.f32 %v873_v1, %v761_v36  ;;  %807 = vmatmul.f32.gmra.mxu1 %v446_v32  ;;  %v295_v32 = vld [vmem:[#allocation2 + $0x48] sm:$0xff] }
  0xd7   : > { %1443 = vmatmul.msk.f32.gmra.mxu2 %vm518_vm0, %v453_v34 }
  0xd8   : > { %v959_v40 = vadd.f32 %v874_v20, %v291_v37  ;;  %v2070_v44 = vpop.f32.mrf.mxu3  ;;  %v1129_v37 = vpop.permute.xlu2 %1128 }
  0xd9   : > { %v1026_v45 = vld [vmem:[#allocation2 + $0x20] sm:$0xff]  ;;  %v879_v46 = vpop.f32.mrf.mxu2  ;;  %v650_v30 = vpop.f32.mrf.mxu0 }
  0xda   : > { %992 = vst.msk [vmem:[#allocation2 + $0x28] sm:$0xff] %vm253_vm1, %v959_v40  ;;  %v1250_v49 = vmul.f32 %v1109_v39, %v1026_v45 }
  0xdb   : > { %v763_v51 = vpop.f32.mrf.mxu1 }
  0xdc   : > { %1282 = vst.msk [vmem:[%s2031_s17 + $0x20] sm:$0xff] %vm253_vm1, %v1250_v49  ;;  %v764_v8 = vadd.f32 %v763_v51, %v650_v30  ;;  %697 = vmatmul.f32.gmra.mxu0 %v448_v47 }
  0xde   : > { %v877_v38 = vadd.f32 %v876_v27, %v764_v8  ;;  %810 = vmatmul.f32.gmra.mxu1 %v449_v2  ;;  %v1134_v2 = vpop.permute.xlu0 %1133 }
  0xdf   : > { %1444 = vmatmul.msk.f32.gmra.mxu2 %vm518_vm0, %v456_v50 }
  0xe0   : > { %v960_v57 = vadd.f32 %v877_v38, %v292_v52 }
  0xe1   : > { %v2078_v58 = vpop.f32.mrf.mxu3  ;;  %v1027_v11 = vld [vmem:[#allocation2 + $0x28] sm:$0xff]  ;;  %v653_v59 = vpop.f32.mrf.mxu0 }
  0xe2   : > { %v882_v14 = vpop.f32.mrf.mxu2  ;;  %993 = vst.msk [vmem:[#allocation2 + $0x30] sm:$0xff] %vm253_vm1, %v960_v57  ;;  %v1251_v17 = vmul.f32 %v1114_v55, %v1027_v11  ;;  %v1139_v11 = vpop.permute.xlu1 %1138 }
  0xe3   : > { %v766_v63 = vpop.f32.mrf.mxu1 }
  0xe4   : > { %1283 = vst.msk [vmem:[%s2031_s17 + $0x28] sm:$0xff] %vm253_vm1, %v1251_v17  ;;  %v767_v0 = vadd.f32 %v766_v63, %v653_v59  ;;  %700 = vmatmul.f32.gmra.mxu0 %v451_v48  ;;  %v1144_v59 = vpop.permute.xlu2 %1143 }
  0xe6   : > { %v880_v1 = vadd.f32 %v879_v46, %v767_v0  ;;  %813 = vmatmul.f32.gmra.mxu1 %v452_v60  ;;  %v296_v46 = vld [vmem:[#allocation2 + $0x50] sm:$0xff]  ;;  %v298_v0 = vld [vmem:[#allocation2 + $0x60] sm:$0xff] }
  0xe7   : > { %1445 = vmatmul.msk.f32.gmra.mxu2 %vm518_vm0, %v459_v61 }
  0xe8   : > { %v961_v24 = vadd.f32 %v880_v1, %v293_v43 }
  0xe9   : > { %v2084_v3 = vpop.f32.mrf.mxu3  ;;  %v1028_v6 = vld [vmem:[#allocation2 + $0x30] sm:$0xff]  ;;  %v656_v12 = vpop.f32.mrf.mxu0 }
  0xea   : > { %v885_v7 = vpop.f32.mrf.mxu2  ;;  %994 = vst.msk [vmem:[#allocation2 + $0x38] sm:$0xff] %vm253_vm1, %v961_v24  ;;  %v1252_v10 = vmul.f32 %v1119_v4, %v1028_v6 }
  0xeb   : > { %v769_v54 = vpop.f32.mrf.mxu1 }
  0xec   : > { %1284 = vst.msk [vmem:[%s2031_s17 + $0x30] sm:$0xff] %vm253_vm1, %v1252_v10  ;;  %v770_v15 = vadd.f32 %v769_v54, %v656_v12 }
  0xee   : > { %v883_v18 = vadd.f32 %v882_v14, %v770_v15  ;;  %v1159_v15 = vpop.permute.xlu2 %1158 }
  0xf0   : > { %v962_v19 = vadd.f32 %v883_v18, %v294_v16  ;;  %v299_v18 = vld [vmem:[#allocation2 + $0x68] sm:$0xff] }
  0xf1   : > { %v817_v22 = vpop.f32.mrf.mxu3  ;;  %v1029_v25 = vld [vmem:[#allocation2 + $0x38] sm:$0xff]  ;;  %v659_v31 = vpop.f32.mrf.mxu0 }
  0xf2   : > { %v2090_v62 = vadd.f32 %v817_v22, %v2015_v13  ;;  %v888_v27 = vpop.f32.mrf.mxu2  ;;  %v1253_v28 = vmul.f32 %v1124_v23, %v1029_v25  ;;  %995 = vst.msk [vmem:[#allocation2 + $0x40] sm:$0xff] %vm253_vm1, %v962_v19 }
  0xf3   : > { %v772_v29 = vpop.f32.mrf.mxu1 }
  0xf4   : > { %1285 = vst.msk [vmem:[%s2031_s17 + $0x38] sm:$0xff] %vm253_vm1, %v1253_v28  ;;  %v773_v33 = vadd.f32 %v772_v29, %v659_v31  ;;  %v1154_v28 = vpop.permute.xlu1 %1153 }
  0xf6   : > { %v886_v34 = vadd.f32 %v885_v7, %v773_v33  ;;  %v1149_v7 = vpop.permute.xlu0 %1148 }
  0xf8   : > { %v963_v9 = vadd.f32 %v886_v34, %v295_v32 }
  0xf9   : > { %v820_v36 = vpop.f32.mrf.mxu3  ;;  %v1030_v39 = vld [vmem:[#allocation2 + $0x40] sm:$0xff]  ;;  %v662_v42 = vpop.f32.mrf.mxu0 }
  0xfa   : > { %v2096_v20 = vadd.f32 %v820_v36, %v2024_v35  ;;  %v891_v13 = vpop.f32.mrf.mxu2  ;;  %996 = vst.msk [vmem:[#allocation2 + $0x48] sm:$0xff] %vm253_vm1, %v963_v9  ;;  %v1254_v41 = vmul.f32 %v1129_v37, %v1030_v39  ;;  %v300_v9 = vld [vmem:[#allocation2 + $0x70] sm:$0xff]  ;;  %v2121_v36 = vpop.permute.xlu2 %1173 }
  0xfb   : > { %v775_v40 = vpop.f32.mrf.mxu1 }
  0xfc   : > { %1286 = vst.msk [vmem:[%s2031_s17 + $0x40] sm:$0xff] %vm253_vm1, %v1254_v41  ;;  %v776_v45 = vadd.f32 %v775_v40, %v662_v42 }
  0xfe   : > { %v889_v47 = vadd.f32 %v888_v27, %v776_v45  ;;  %v1164_v32 = vpop.permute.xlu0 %1163 }
 0x100   : > { %v964_v49 = vadd.f32 %v889_v47, %v296_v46  ;;  %v1169_v47 = vpop.permute.xlu1 %1168 }
 0x101   : > { %v2101_v30 = vpop.f32.mrf.mxu3  ;;  %v1031_v50 = vld [vmem:[#allocation2 + $0x48] sm:$0xff]  ;;  %v665_v8 = vpop.f32.mrf.mxu0 }
 0x102   : > { %v894_v51 = vpop.f32.mrf.mxu2  ;;  %v1255_v35 = vmul.f32 %v1134_v2, %v1031_v50  ;;  %997 = vst.msk [vmem:[#allocation2 + $0x50] sm:$0xff] %vm253_vm1, %v964_v49  ;;  %v301_v2 = vld [vmem:[#allocation2 + $0x78] sm:$0xff] }
 0x103   : > { %v778_v52 = vpop.f32.mrf.mxu1 }
 0x104   : > { %1287 = vst.msk [vmem:[%s2031_s17 + $0x48] sm:$0xff] %vm253_vm1, %v1255_v35  ;;  %v779_v38 = vadd.f32 %v778_v52, %v665_v8  ;;  %v2130_v35 = vpop.permute.xlu2 %1188 }
 0x106   : > { %v892_v55 = vadd.f32 %v891_v13, %v779_v38  ;;  %v2128_v50 = vpop.permute.xlu0 %1178 }
 0x108   : > { %v965_v56 = vadd.f32 %v892_v55, %v297_v53 }
 0x109   : > { %v2106_v57 = vpop.f32.mrf.mxu3  ;;  %v1032_v14 = vld [vmem:[#allocation2 + $0x50] sm:$0xff]  ;;  %v668_v60 = vpop.f32.mrf.mxu0 }
 0x10a   : > { %v897_v48 = vpop.f32.mrf.mxu2  ;;  %v1256_v17 = vmul.f32 %v1139_v11, %v1032_v14  ;;  %998 = vst.msk [vmem:[#allocation2 + $0x58] sm:$0xff] %vm253_vm1, %v965_v56 }
 0x10b   : > { %v781_v61 = vpop.f32.mrf.mxu1 }
 0x10c   : > { %1288 = vst.msk [vmem:[%s2031_s17 + $0x50] sm:$0xff] %vm253_vm1, %v1256_v17  ;;  %v782_v63 = vadd.f32 %v781_v61, %v668_v60  ;;  %v2137_v17 = vpop.permute.xlu1 %1183  ;;  %v824_v60 = vadd.f32 %v2101_v30, %v2041_v5  ;;  %v303_v5 = vld [vmem:[#allocation2 + $0x88] sm:$0xff] }
 0x10e   : > { %v895_v43 = vadd.f32 %v894_v51, %v782_v63  ;;  %v2141_v61 = vpop.permute.xlu0 %1193 }
 0x110   : > { %v966_v1 = vadd.f32 %v895_v43, %v298_v0  ;;  %v312_v0 = vld [vmem:[#allocation2 + $0xd0] sm:$0xff] }
 0x111   : > { %v2111_v24 = vpop.f32.mrf.mxu3  ;;  %v1033_v4 = vld [vmem:[#allocation2 + $0x58] sm:$0xff]  ;;  %v671_v12 = vpop.f32.mrf.mxu0 }
 0x112   : > { %v900_v6 = vpop.f32.mrf.mxu2  ;;  %v1257_v10 = vmul.f32 %v1144_v59, %v1033_v4  ;;  %999 = vst.msk [vmem:[#allocation2 + $0x60] sm:$0xff] %vm253_vm1, %v966_v1 }
 0x113   : > { %v784_v54 = vpop.f32.mrf.mxu1 }
 0x114   : > { %1289 = vst.msk [vmem:[%s2031_s17 + $0x58] sm:$0xff] %vm253_vm1, %v1257_v10  ;;  %v785_v16 = vadd.f32 %v784_v54, %v671_v12 }
 0x116   : > { %v898_v19 = vadd.f32 %v897_v48, %v785_v16  ;;  %v302_v48 = vld [vmem:[#allocation2 + $0x80] sm:$0xff] }
 0x118   : > { %v967_v22 = vadd.f32 %v898_v19, %v299_v18  ;;  %v827_v18 = vadd.f32 %v2106_v57, %v2051_v21  ;;  %v2151_v19 = vpop.permute.xlu1 %1198 }
 0x119   : > { %v2116_v23 = vpop.f32.mrf.mxu3  ;;  %v1034_v25 = vld [vmem:[#allocation2 + $0x60] sm:$0xff]  ;;  %v674_v29 = vpop.f32.mrf.mxu0 }
 0x11a   : > { %v903_v27 = vpop.f32.mrf.mxu2  ;;  %v1258_v31 = vmul.f32 %v1149_v7, %v1034_v25  ;;  %1000 = vst.msk [vmem:[#allocation2 + $0x68] sm:$0xff] %vm253_vm1, %v967_v22  ;;  %v2143_v7 = vpop.permute.xlu2 %1203  ;;  %v313_v25 = vld [vmem:[#allocation2 + $0xd8] sm:$0xff] }
 0x11b   : > { %v787_v33 = vpop.f32.mrf.mxu1 }
 0x11c   : > { %1290 = vst.msk [vmem:[%s2031_s17 + $0x60] sm:$0xff] %vm253_vm1, %v1258_v31  ;;  %v788_v34 = vadd.f32 %v787_v33, %v674_v29  ;;  %v2153_v33 = vpop.permute.xlu0 %1208 }
 0x11e   : > { %v901_v37 = vadd.f32 %v900_v6, %v788_v34 }
 0x120   : > { %v968_v39 = vadd.f32 %v901_v37, %v300_v9 }
 0x121   : > { %v2123_v13 = vpop.f32.mrf.mxu3  ;;  %v1035_v41 = vld [vmem:[#allocation2 + $0x68] sm:$0xff]  ;;  %v677_v45 = vpop.f32.mrf.mxu0 }
 0x122   : > { %v906_v42 = vpop.f32.mrf.mxu2  ;;  %v1259_v40 = vmul.f32 %v1154_v28, %v1035_v41  ;;  %1001 = vst.msk [vmem:[#allocation2 + $0x70] sm:$0xff] %vm253_vm1, %v968_v39  ;;  %v1219_v39 = vpop.permute.xlu2 %1218 }
 0x123   : > { %v790_v46 = vpop.f32.mrf.mxu1 }
 0x124   : > { %1291 = vst.msk [vmem:[%s2031_s17 + $0x68] sm:$0xff] %vm253_vm1, %v1259_v40  ;;  %v791_v49 = vadd.f32 %v790_v46, %v677_v45  ;;  %v830_v45 = vadd.f32 %v2111_v24, %v2061_v26 }
 0x126   : > { %v904_v51 = vadd.f32 %v903_v27, %v791_v49 }
 0x128   : > { %v969_v8 = vadd.f32 %v904_v51, %v301_v2 }
 0x129   : > { %v2132_v52 = vpop.f32.mrf.mxu3  ;;  %v1036_v38 = vld [vmem:[#allocation2 + $0x70] sm:$0xff]  ;;  %v680_v56 = vpop.f32.mrf.mxu0 }
 0x12a   : > { %v909_v53 = vpop.f32.mrf.mxu2  ;;  %v1260_v55 = vmul.f32 %v1159_v15, %v1036_v38  ;;  %1002 = vst.msk [vmem:[#allocation2 + $0x78] sm:$0xff] %vm253_vm1, %v969_v8  ;;  %v2163_v38 = vpop.permute.xlu1 %1213 }
 0x12b   : > { %v793_v11 = vpop.f32.mrf.mxu1 }
 0x12c   : > { %1292 = vst.msk [vmem:[%s2031_s17 + $0x70] sm:$0xff] %vm253_vm1, %v1260_v55  ;;  %v794_v14 = vadd.f32 %v793_v11, %v680_v56 }
 0x12e   : > { %v907_v59 = vadd.f32 %v906_v42, %v794_v14  ;;  %v304_v42 = vld [vmem:[#allocation2 + $0x90] sm:$0xff]  ;;  %v1224_v14 = vpop.permute.xlu0 %1223 }
 0x130   : > { %v970_v63 = vadd.f32 %v907_v59, %v302_v48  ;;  %v305_v59 = vld [vmem:[#allocation2 + $0x98] sm:$0xff] }
 0x131   : > { %v936_v43 = vpop.f32.mrf.mxu3  ;;  %v1037_v1 = vld [vmem:[#allocation2 + $0x78] sm:$0xff]  ;;  %v683_v12 = vpop.f32.mrf.mxu0 }
 0x132   : > { %v912_v4 = vpop.f32.mrf.mxu2  ;;  %v937_v6 = vadd.f32 %v936_v43, %v824_v60  ;;  %v1261_v10 = vmul.f32 %v1164_v32, %v1037_v1  ;;  %1003 = vst.msk [vmem:[#allocation2 + $0x80] sm:$0xff] %vm253_vm1, %v970_v63  ;;  %v833_v63 = vadd.f32 %v2116_v23, %v2070_v44 }
 0x133   : > { %v796_v15 = vpop.f32.mrf.mxu1 }
 0x134   : > { %v980_v54 = vadd.f32 %v937_v6, %v312_v0  ;;  %1293 = vst.msk [vmem:[%s2031_s17 + $0x78] sm:$0xff] %vm253_vm1, %v1261_v10  ;;  %v797_v16 = vadd.f32 %v796_v15, %v683_v12  ;;  %v315_v0 = vld [vmem:[#allocation2 + $0xe8] sm:$0xff] }
 0x136   : > { %1013 = vst.msk [vmem:[#allocation2 + $0xd0] sm:$0xff] %vm253_vm1, %v980_v54  ;;  %v910_v30 = vadd.f32 %v909_v53, %v797_v16  ;;  %v1229_v16 = vpop.permute.xlu1 %1228 }
 0x138   : > { %v971_v22 = vadd.f32 %v910_v30, %v303_v5  ;;  %v306_v30 = vld [vmem:[#allocation2 + $0xa0] sm:$0xff] }
 0x139   : > { %v939_v27 = vpop.f32.mrf.mxu3  ;;  %v1038_v28 = vld [vmem:[#allocation2 + $0x80] sm:$0xff]  ;;  %v686_v34 = vpop.f32.mrf.mxu0 }
 0x13a   : > { %v915_v31 = vpop.f32.mrf.mxu2  ;;  %v940_v29 = vadd.f32 %v939_v27, %v827_v18  ;;  %v1262_v32 = vmul.f32 %v1169_v47, %v1038_v28  ;;  %1004 = vst.msk [vmem:[#allocation2 + $0x88] sm:$0xff] %vm253_vm1, %v971_v22  ;;  %v314_v47 = vld [vmem:[#allocation2 + $0xe0] sm:$0xff]  ;;  %v836_v22 = vadd.f32 %v2123_v13, %v2078_v58 }
 0x13b   : > { %v799_v37 = vpop.f32.mrf.mxu1 }
 0x13c   : > { %v981_v9 = vadd.f32 %v940_v29, %v313_v25  ;;  %1294 = vst.msk [vmem:[%s2031_s17 + $0x80] sm:$0xff] %vm253_vm1, %v1262_v32  ;;  %v800_v57 = vadd.f32 %v799_v37, %v686_v34  ;;  %v316_v25 = vld [vmem:[#allocation2 + $0xf0] sm:$0xff] }
 0x13d   : > { %v1048_v21 = vld [vmem:[#allocation2 + $0xd0] sm:$0xff] }
 0x13e   : > { %v1272_v41 = vmul.f32 %v1219_v39, %v1048_v21  ;;  %1014 = vst.msk [vmem:[#allocation2 + $0xd8] sm:$0xff] %vm253_vm1, %v981_v9  ;;  %v913_v40 = vadd.f32 %v912_v4, %v800_v57  ;;  %v1234_v39 = vpop.permute.xlu2 %1233  ;;  %v307_v57 = vld [vmem:[#allocation2 + $0xa8] sm:$0xff] }
 0x140   : > { %1304 = vst.msk [vmem:[%s2031_s17 + $0xd0] sm:$0xff] %vm253_vm1, %v1272_v41  ;;  %v972_v46 = vadd.f32 %v913_v40, %v304_v42  ;;  %v839_v42 = vadd.f32 %v2132_v52, %v2084_v3  ;;  %v317_v40 = vld [vmem:[#allocation2 + $0xf8] sm:$0xff] }
 0x141   : > { %v942_v49 = vpop.f32.mrf.mxu3  ;;  %v1039_v2 = vld [vmem:[#allocation2 + $0x88] sm:$0xff]  ;;  %v689_v55 = vpop.f32.mrf.mxu0 }
 0x142   : > { %v918_v51 = vpop.f32.mrf.mxu2  ;;  %v943_v8 = vadd.f32 %v942_v49, %v830_v45  ;;  %v1263_v53 = vmul.f32 %v2121_v36, %v1039_v2  ;;  %1005 = vst.msk [vmem:[#allocation2 + $0x90] sm:$0xff] %vm253_vm1, %v972_v46 }
 0x143   : > { %v802_v11 = vpop.f32.mrf.mxu1 }
 0x144   : > { %v982_v56 = vadd.f32 %v943_v8, %v314_v47  ;;  %1295 = vst.msk [vmem:[%s2031_s17 + $0x88] sm:$0xff] %vm253_vm1, %v1263_v53  ;;  %v803_v24 = vadd.f32 %v802_v11, %v689_v55  ;;  %v1239_v55 = vpop.permute.xlu0 %1238  ;;  %v308_v11 = vld [vmem:[#allocation2 + $0xb0] sm:$0xff] }
 0x145   : > { %v1049_v26 = vld [vmem:[#allocation2 + $0xd8] sm:$0xff] }
 0x146   : > { %v1273_v48 = vmul.f32 %v1224_v14, %v1049_v26  ;;  %1015 = vst.msk [vmem:[#allocation2 + $0xe0] sm:$0xff] %vm253_vm1, %v982_v56  ;;  %v916_v60 = vadd.f32 %v915_v31, %v803_v24  ;;  %v310_v24 = vld [vmem:[#allocation2 + $0xc0] sm:$0xff] }
 0x148   : > { %1305 = vst.msk [vmem:[%s2031_s17 + $0xd8] sm:$0xff] %vm253_vm1, %v1273_v48  ;;  %v973_v36 = vadd.f32 %v916_v60, %v305_v59 }
 0x149   : > { %v945_v43 = vpop.f32.mrf.mxu3  ;;  %v1040_v1 = vld [vmem:[#allocation2 + $0x90] sm:$0xff]  ;;  %v692_v12 = vpop.f32.mrf.mxu0 }
 0x14a   : > { %v921_v4 = vpop.f32.mrf.mxu2  ;;  %v946_v6 = vadd.f32 %v945_v43, %v833_v63  ;;  %v1264_v10 = vmul.f32 %v2128_v50, %v1040_v1  ;;  %1006 = vst.msk [vmem:[#allocation2 + $0x98] sm:$0xff] %vm253_vm1, %v973_v36 }
 0x14b   : > { %v805_v15 = vpop.f32.mrf.mxu1 }
 0x14c   : > { %v983_v54 = vadd.f32 %v946_v6, %v315_v0  ;;  %1296 = vst.msk [vmem:[%s2031_s17 + $0x90] sm:$0xff] %vm253_vm1, %v1264_v10  ;;  %v806_v23 = vadd.f32 %v805_v15, %v692_v12  ;;  %v1244_v0 = vpop.permute.xlu1 %1243  ;;  %v309_v10 = vld [vmem:[#allocation2 + $0xb8] sm:$0xff] }
 0x14d   : > { %v1050_v44 = vld [vmem:[#allocation2 + $0xe0] sm:$0xff] }
 0x14e   : > { %v1274_v5 = vmul.f32 %v1229_v16, %v1050_v44  ;;  %1016 = vst.msk [vmem:[#allocation2 + $0xe8] sm:$0xff] %vm253_vm1, %v983_v54  ;;  %v919_v18 = vadd.f32 %v918_v51, %v806_v23  ;;  %v311_v54 = vld [vmem:[#allocation2 + $0xc8] sm:$0xff] }
 0x150   : > { %1306 = vst.msk [vmem:[%s2031_s17 + $0xe0] sm:$0xff] %vm253_vm1, %v1274_v5  ;;  %v974_v50 = vadd.f32 %v919_v18, %v306_v30 }
 0x151   : > { %v948_v27 = vpop.f32.mrf.mxu3  ;;  %v1041_v28 = vld [vmem:[#allocation2 + $0x98] sm:$0xff]  ;;  %v695_v34 = vpop.f32.mrf.mxu0 }
 0x152   : > { %v924_v31 = vpop.f32.mrf.mxu2  ;;  %v949_v29 = vadd.f32 %v948_v27, %v836_v22  ;;  %v1265_v32 = vmul.f32 %v2137_v17, %v1041_v28  ;;  %1007 = vst.msk [vmem:[#allocation2 + $0xa0] sm:$0xff] %vm253_vm1, %v974_v50 }
 0x153   : > { %v808_v37 = vpop.f32.mrf.mxu1 }
 0x154   : > { %v984_v9 = vadd.f32 %v949_v29, %v316_v25  ;;  %1297 = vst.msk [vmem:[%s2031_s17 + $0x98] sm:$0xff] %vm253_vm1, %v1265_v32  ;;  %v809_v13 = vadd.f32 %v808_v37, %v695_v34 }
 0x155   : > { %v1051_v58 = vld [vmem:[#allocation2 + $0xe8] sm:$0xff] }
 0x156   : > { %v1275_v21 = vmul.f32 %v1234_v39, %v1051_v58  ;;  %1017 = vst.msk [vmem:[#allocation2 + $0xf0] sm:$0xff] %vm253_vm1, %v984_v9  ;;  %v922_v41 = vadd.f32 %v921_v4, %v809_v13 }
 0x158   : > { %1307 = vst.msk [vmem:[%s2031_s17 + $0xe8] sm:$0xff] %vm253_vm1, %v1275_v21  ;;  %v975_v17 = vadd.f32 %v922_v41, %v307_v57 }
 0x159   : > { %v951_v45 = vpop.f32.mrf.mxu3  ;;  %v1042_v46 = vld [vmem:[#allocation2 + $0xa0] sm:$0xff]  ;;  %v698_v51 = vpop.f32.mrf.mxu0 }
 0x15a   : > { %v927_v47 = vpop.f32.mrf.mxu2  ;;  %v952_v49 = vadd.f32 %v951_v45, %v839_v42  ;;  %v1266_v2 = vmul.f32 %v2130_v35, %v1042_v46  ;;  %1008 = vst.msk [vmem:[#allocation2 + $0xa8] sm:$0xff] %vm253_vm1, %v975_v17 }
 0x15b   : > { %v811_v53 = vpop.f32.mrf.mxu1 }
 0x15c   : > { %v985_v8 = vadd.f32 %v952_v49, %v317_v40  ;;  %1298 = vst.msk [vmem:[%s2031_s17 + $0xa0] sm:$0xff] %vm253_vm1, %v1266_v2  ;;  %v812_v52 = vadd.f32 %v811_v53, %v698_v51 }
 0x15d   : > { %v1052_v3 = vld [vmem:[#allocation2 + $0xf0] sm:$0xff] }
 0x15e   : > { %v1276_v56 = vmul.f32 %v1239_v55, %v1052_v3  ;;  %1018 = vst.msk [vmem:[#allocation2 + $0xf8] sm:$0xff] %vm253_vm1, %v985_v8  ;;  %v925_v14 = vadd.f32 %v924_v31, %v812_v52 }
 0x160   : > { %1308 = vst.msk [vmem:[%s2031_s17 + $0xf0] sm:$0xff] %vm253_vm1, %v1276_v56  ;;  %v976_v26 = vadd.f32 %v925_v14, %v308_v11 }
 0x161   : > { %v1043_v35 = vld [vmem:[#allocation2 + $0xa8] sm:$0xff]  ;;  %v701_v63 = vpop.f32.mrf.mxu0 }
 0x162   : > { %v930_v48 = vpop.f32.mrf.mxu2  ;;  %v1267_v59 = vmul.f32 %v2141_v61, %v1043_v35  ;;  %1009 = vst.msk [vmem:[#allocation2 + $0xb0] sm:$0xff] %vm253_vm1, %v976_v26 }
 0x163   : > { %v931_v60 = vadd.f32 %v930_v48, %v2090_v62  ;;  %v814_v36 = vpop.f32.mrf.mxu1 }
 0x164   : > { %1299 = vst.msk [vmem:[%s2031_s17 + $0xa8] sm:$0xff] %vm253_vm1, %v1267_v59  ;;  %v815_v4 = vadd.f32 %v814_v36, %v701_v63 }
 0x165   : > { %v1053_v43 = vld [vmem:[#allocation2 + $0xf8] sm:$0xff]  ;;  %v978_v1 = vadd.f32 %v931_v60, %v310_v24 }
 0x166   : > { %v1277_v6 = vmul.f32 %v1244_v0, %v1053_v43  ;;  %v928_v12 = vadd.f32 %v927_v47, %v815_v4 }
 0x167   : > { %1011 = vst.msk [vmem:[#allocation2 + $0xc0] sm:$0xff] %vm253_vm1, %v978_v1 }
 0x168   : > { %1309 = vst.msk [vmem:[%s2031_s17 + $0xf8] sm:$0xff] %vm253_vm1, %v1277_v6  ;;  %v977_v61 = vadd.f32 %v928_v12, %v309_v10 }
 0x169   : > { %v1044_v62 = vld [vmem:[#allocation2 + $0xb0] sm:$0xff] }
 0x16a   : > { %v933_v15 = vpop.f32.mrf.mxu2  ;;  %v1268_v16 = vmul.f32 %v2151_v19, %v1044_v62  ;;  %1010 = vst.msk [vmem:[#allocation2 + $0xb8] sm:$0xff] %vm253_vm1, %v977_v61 }
 0x16b   : > { %v934_v44 = vadd.f32 %v933_v15, %v2096_v20 }
 0x16c   : > { %1300 = vst.msk [vmem:[%s2031_s17 + $0xb0] sm:$0xff] %vm253_vm1, %v1268_v16 }
 0x16d   : > { %v979_v23 = vadd.f32 %v934_v44, %v311_v54 }
 0x16e   : > { %v1046_v5 = vld [vmem:[#allocation2 + $0xc0] sm:$0xff] }
 0x16f   : > { %v1270_v30 = vmul.f32 %v2153_v33, %v1046_v5  ;;  %1012 = vst.msk [vmem:[#allocation2 + $0xc8] sm:$0xff] %vm253_vm1, %v979_v23 }
 0x171   : > { %1302 = vst.msk [vmem:[%s2031_s17 + $0xc0] sm:$0xff] %vm253_vm1, %v1270_v30  ;;  %v1045_v18 = vld [vmem:[#allocation2 + $0xb8] sm:$0xff] }
 0x172   : > { %v1269_v22 = vmul.f32 %v2143_v7, %v1045_v18 }
 0x174   : > { %1301 = vst.msk [vmem:[%s2031_s17 + $0xb8] sm:$0xff] %vm253_vm1, %v1269_v22 }
 0x176   : > { %v1047_v19 = vld [vmem:[#allocation2 + $0xc8] sm:$0xff] }
 0x177   : > { %v1271_v50 = vmul.f32 %v2163_v38, %v1047_v19 }
 0x179   : > { %1303 = vst.msk [vmem:[%s2031_s17 + $0xc8] sm:$0xff] %vm253_vm1, %v1271_v50 }
 0x17a PF: > { %s13_s14 = sadd.s32 1, %s1546_s14   ;;  %s2235_s12 = smov %s1542_s13 }
 0x17b   : > { %p10_p5 = scmp.ge.s32.totalorder %s13_s14, 4   ;;  %s2236_s13 = smov %s2238_s15 }
 0x17d   :  { %12 = sbr.rel (!%p10_p5) target bundleno = 2 (0x2), region = 76 }

</bundles_post_ra>
